<compile_context>
chip_gen: v6e
topology: v6e:2x2x1
jax: 0.10.0
libtpu: 0.0.40
codegen_flags: <defaults>
</compile_context>

<pallas_src>
import functools

import jax
import jax.numpy as jnp
from jax import lax
from jax.experimental import pallas as pl
from jax.experimental.pallas import tpu as pltpu


def _ls_ce_partial_kernel(preds_ref, target_ref, out_ref, *, n_total: int):
    """Per-tile partial sums of the two loss terms.

    preds_ref : (TILE_N, C)  input dtype (upcast to f32 inside)
    target_ref: (TILE_N, 1)  int32 class indices
    out_ref   : (1, 8, 128)  f32; [0,0,0] = sum_i -sum_c log_softmax(x_i)_c
                                   [0,1,0] = sum_i -log_softmax(x_i)_{t_i}
    """
    pid = pl.program_id(0)
    x = preds_ref[...].astype(jnp.float32)          # (T, C) f32
    tile_rows, n_cls = x.shape

    # Numerically-stable logsumexp along the class (lane) axis.
    row_max = jnp.max(x, axis=-1, keepdims=True)                      # (T, 1)
    sumexp = jnp.sum(jnp.exp(x - row_max), axis=-1, keepdims=True)    # (T, 1)
    z = row_max + jnp.log(sumexp)                                     # (T, 1)  = max + lse

    # Smoothing term: -sum_c log_softmax = C*z - sum_c x   (log_preds never built)
    row_sum_x = jnp.sum(x, axis=-1, keepdims=True)                    # (T, 1)
    loss_row = jnp.float32(n_cls) * z - row_sum_x                     # (T, 1)

    # NLL term: -log_softmax[target] = z - x[target]  via lane-iota one-hot select.
    class_ids = lax.broadcasted_iota(jnp.int32, (1, n_cls), 1)        # (1, C)
    tgt = target_ref[...]                                             # (T, 1) int32
    x_tgt = jnp.sum(jnp.where(class_ids == tgt, x, 0.0),
                    axis=-1, keepdims=True)                           # (T, 1)
    # NOTE: out-of-range targets silently select 0 (PyTorch would raise).
    nll_row = z - x_tgt                                               # (T, 1)

    # Mask rows past the global batch size (padded edge tile).  jnp.where is a
    # select, so garbage/NaN in padded rows cannot leak into the sums.
    row_ids = pid * tile_rows + lax.broadcasted_iota(jnp.int32, (tile_rows, 1), 0)
    valid = row_ids < n_total
    loss_part = jnp.sum(jnp.where(valid, loss_row, 0.0))
    nll_part = jnp.sum(jnp.where(valid, nll_row, 0.0))

    # Lane-dense (1, 8, 128) store: sublane 0 carries the smoothing-term partial,
    # sublane 1 the NLL partial.
    sub = lax.broadcasted_iota(jnp.int32, out_ref.shape, 1)
    out_ref[...] = jnp.where(sub == 0, loss_part,
                             jnp.where(sub == 1, nll_part, 0.0)).astype(jnp.float32)


def label_smoothing_cross_entropy(preds, target, *, epsilon: float = 0.1,
                                  reduction: str = "mean", tile_n: int | None = None):
    """preds: (N, C) float (any dtype), target: (N,) int. Matches the PyTorch module."""
    n, c = preds.shape
    target2d = target.astype(jnp.int32).reshape(n, 1)
    in_bytes = jnp.dtype(preds.dtype).itemsize

    # ---- pick a row tile -----------------------------------------------------
    if tile_n is None:
        # Keep each preds block around ~2 MiB so 2x double-buffering plus f32
        # temporaries stay well under v7x's 64 MiB physical VMEM (v5e/v6e have
        # more headroom but the same tile still hits HBM roofline).
        budget = 2 * 1024 * 1024
        tile_n = budget // max(1, c * in_bytes)
        tile_n = max(8, min(512, (tile_n // 8) * 8))
    if n <= 8:
        tile_n = n                                   # single full block
    else:
        tile_n = max(8, min((tile_n // 8) * 8, (n // 8) * 8))
    num_tiles = pl.cdiv(n, tile_n)

    # ---- VMEM budget hint ----------------------------------------------------
    preds_block = tile_n * c * in_bytes
    f32_block = tile_n * c * 4
    vmem_limit = 4 * preds_block + 8 * f32_block + (4 << 20)
    vmem_limit = int(min(max(vmem_limit, 16 << 20), 64 << 20))

    partials = pl.pallas_call(
        functools.partial(_ls_ce_partial_kernel, n_total=n),
        out_shape=jax.ShapeDtypeStruct((num_tiles, 8, 128), jnp.float32),
        grid_spec=pl.GridSpec(
            grid=(num_tiles,),
            in_specs=[
                pl.BlockSpec((tile_n, c), lambda i: (i, 0)),
                pl.BlockSpec((tile_n, 1), lambda i: (i, 0)),
            ],
            out_specs=pl.BlockSpec((1, 8, 128), lambda i: (i, 0, 0)),
        ),
        compiler_params=pltpu.CompilerParams(
            dimension_semantics=("parallel",),
            vmem_limit_bytes=vmem_limit,
        ),
    )(preds, target2d)     # preds passed in native dtype; upcast happens per-tile

    loss_sum = jnp.sum(partials[:, 0, 0])
    nll_sum = jnp.sum(partials[:, 1, 0])

    if reduction == "mean":
        loss_red = loss_sum / jnp.float32(n)
        nll_red = nll_sum / jnp.float32(n)
    elif reduction == "sum":
        loss_red = loss_sum
        nll_red = nll_sum
    else:
        # TODO(synk): reduction='none' needs a per-row output path; not implemented.
        raise NotImplementedError("only 'mean' and 'sum' reductions are implemented")

    eps = jnp.float32(epsilon)
    return loss_red / jnp.float32(c) * eps + (1.0 - eps) * nll_red


def _reference(preds, target, epsilon=0.1):
    # Pure-JAX reference mirroring the PyTorch module (reduction='mean').
    n_cls = preds.shape[-1]
    log_preds = jax.nn.log_softmax(preds.astype(jnp.float32), axis=-1)
    loss = jnp.mean(-log_preds.sum(axis=-1))
    nll = jnp.mean(-jnp.take_along_axis(log_preds, target[:, None], axis=-1)[:, 0])
    return loss / n_cls * epsilon + (1 - epsilon) * nll


if __name__ == "__main__":
    key = jax.random.PRNGKey(0)
    k1, k2, k3, k4 = jax.random.split(key, 4)

    # Case 1: multiple parallel row tiles (3 tiles of 8 rows), 128-wide lane axis.
    n1, c1 = 24, 128
    preds1 = jax.random.normal(k1, (n1, c1), dtype=jnp.float32)
    tgt1 = jax.random.randint(k2, (n1,), 0, c1, dtype=jnp.int32)
    out1 = jax.block_until_ready(
        label_smoothing_cross_entropy(preds1, tgt1, epsilon=0.1, tile_n=8))
    ref1 = _reference(preds1, tgt1, epsilon=0.1)
    assert jnp.allclose(out1, ref1, rtol=1e-4, atol=1e-4), (out1, ref1)

    # Case 2: N not a multiple of the row tile -> exercises edge-row masking.
    n2, c2 = 10, 32
    preds2 = jax.random.normal(k3, (n2, c2), dtype=jnp.float32)
    tgt2 = jax.random.randint(k4, (n2,), 0, c2, dtype=jnp.int32)
    out2 = jax.block_until_ready(
        label_smoothing_cross_entropy(preds2, tgt2, epsilon=0.1))
    ref2 = _reference(preds2, tgt2, epsilon=0.1)
    assert jnp.allclose(out2, ref2, rtol=1e-4, atol=1e-4), (out2, ref2)

    print("KERNEL_OK")
</pallas_src>

<mosaic_0001>
module attributes {stable_mosaic.version = 11 : i64} {
  func.func @_ls_ce_partial_kernel(%arg0: i32, %arg1: memref<8x128xf32, #tpu.memory_space<vmem>>, %arg2: memref<8x1xi32, #tpu.memory_space<vmem>>, %arg3: memref<1x8x128xf32, #tpu.memory_space<vmem>>) attributes {dimension_semantics = [#tpu.dimension_semantics<parallel>], iteration_bounds = array<i64: 3>, scalar_prefetch = 0 : i64, scratch_operands = 0 : i64, tpu.core_type = #tpu.core_type<tc>, window_params = [{transform_indices = @transform_0, window_bounds = array<i64: 8, 128>}, {transform_indices = @transform_1, window_bounds = array<i64: 8, 1>}, {transform_indices = @transform_2, window_bounds = array<i64: 1, 8, 128>}]} {
    %c0 = arith.constant 0 : index
    %c0_0 = arith.constant 0 : index
    %0 = vector.load %arg1[%c0, %c0_0] : memref<8x128xf32, #tpu.memory_space<vmem>>, vector<8x128xf32>
    %cst = arith.constant dense<0xFF800000> : vector<8xf32>
    %1 = vector.multi_reduction <maximumf>, %0, %cst [1] : vector<8x128xf32> to vector<8xf32>
    %2 = vector.shape_cast %1 : vector<8xf32> to vector<8x1xf32>
    %3 = vector.broadcast %2 : vector<8x1xf32> to vector<8x128xf32>
    %4 = arith.subf %0, %3 : vector<8x128xf32>
    %5 = math.exp %4 : vector<8x128xf32>
    %cst_1 = arith.constant dense<0.000000e+00> : vector<8xf32>
    %6 = vector.multi_reduction <add>, %5, %cst_1 [1] : vector<8x128xf32> to vector<8xf32>
    %7 = vector.shape_cast %6 : vector<8xf32> to vector<8x1xf32>
    %8 = math.log %7 : vector<8x1xf32>
    %9 = arith.addf %2, %8 : vector<8x1xf32>
    %cst_2 = arith.constant dense<0.000000e+00> : vector<8xf32>
    %10 = vector.multi_reduction <add>, %0, %cst_2 [1] : vector<8x128xf32> to vector<8xf32>
    %11 = vector.shape_cast %10 : vector<8xf32> to vector<8x1xf32>
    %cst_3 = arith.constant 1.280000e+02 : f32
    %12 = vector.broadcast %cst_3 : f32 to vector<8x1xf32>
    %13 = arith.mulf %12, %9 : vector<8x1xf32>
    %14 = arith.subf %13, %11 : vector<8x1xf32>
    %15 = tpu.iota {dimensions = array<i32: 1>} : vector<1x128xi32>
    %c0_4 = arith.constant 0 : index
    %c0_5 = arith.constant 0 : index
    %16 = vector.load %arg2[%c0_4, %c0_5] : memref<8x1xi32, #tpu.memory_space<vmem>>, vector<8x1xi32>
    %17 = vector.broadcast %15 : vector<1x128xi32> to vector<8x128xi32>
    %18 = vector.broadcast %16 : vector<8x1xi32> to vector<8x128xi32>
    %19 = arith.cmpi eq, %17, %18 : vector<8x128xi32>
    %cst_6 = arith.constant 0.000000e+00 : f32
    %20 = vector.broadcast %cst_6 : f32 to vector<8x128xf32>
    %21 = arith.select %19, %0, %20 : vector<8x128xi1>, vector<8x128xf32>
    %cst_7 = arith.constant dense<0.000000e+00> : vector<8xf32>
    %22 = vector.multi_reduction <add>, %21, %cst_7 [1] : vector<8x128xf32> to vector<8xf32>
    %23 = vector.shape_cast %22 : vector<8xf32> to vector<8x1xf32>
    %24 = arith.subf %9, %23 : vector<8x1xf32>
    %c8_i32 = arith.constant 8 : i32
    %25 = arith.muli %arg0, %c8_i32 : i32
    %26 = tpu.iota {dimensions = array<i32: 0>} : vector<8x1xi32>
    %27 = vector.broadcast %25 : i32 to vector<8x1xi32>
    %28 = arith.addi %27, %26 : vector<8x1xi32>
    %c24_i32 = arith.constant 24 : i32
    %29 = vector.broadcast %c24_i32 : i32 to vector<8x1xi32>
    %30 = arith.cmpi slt, %28, %29 : vector<8x1xi32>
    %cst_8 = arith.constant 0.000000e+00 : f32
    %31 = vector.broadcast %cst_8 : f32 to vector<8x1xf32>
    %32 = arith.select %30, %14, %31 : vector<8x1xi1>, vector<8x1xf32>
    %33 = vector.shape_cast %32 : vector<8x1xf32> to vector<1x8x1xf32>
    %cst_9 = arith.constant dense<0.000000e+00> : vector<1xf32>
    %34 = vector.multi_reduction <add>, %33, %cst_9 [1, 2] : vector<1x8x1xf32> to vector<1xf32>
    %35 = vector.shape_cast %34 : vector<1xf32> to vector<1x1x1xf32>
    %36 = vector.extract %35[0, 0, 0] : f32 from vector<1x1x1xf32>
    %cst_10 = arith.constant 0.000000e+00 : f32
    %37 = vector.broadcast %cst_10 : f32 to vector<8x1xf32>
    %38 = arith.select %30, %24, %37 : vector<8x1xi1>, vector<8x1xf32>
    %39 = vector.shape_cast %38 : vector<8x1xf32> to vector<1x8x1xf32>
    %cst_11 = arith.constant dense<0.000000e+00> : vector<1xf32>
    %40 = vector.multi_reduction <add>, %39, %cst_11 [1, 2] : vector<1x8x1xf32> to vector<1xf32>
    %41 = vector.shape_cast %40 : vector<1xf32> to vector<1x1x1xf32>
    %42 = vector.extract %41[0, 0, 0] : f32 from vector<1x1x1xf32>
    %43 = tpu.iota {dimensions = array<i32: 1>} : vector<1x8x128xi32>
    %c0_i32 = arith.constant 0 : i32
    %44 = vector.broadcast %c0_i32 : i32 to vector<1x8x128xi32>
    %45 = arith.cmpi eq, %43, %44 : vector<1x8x128xi32>
    %c1_i32 = arith.constant 1 : i32
    %46 = vector.broadcast %c1_i32 : i32 to vector<1x8x128xi32>
    %47 = arith.cmpi eq, %43, %46 : vector<1x8x128xi32>
    %cst_12 = arith.constant 0.000000e+00 : f32
    %48 = vector.broadcast %42 : f32 to vector<1x8x128xf32>
    %49 = vector.broadcast %cst_12 : f32 to vector<1x8x128xf32>
    %50 = arith.select %47, %48, %49 : vector<1x8x128xi1>, vector<1x8x128xf32>
    %51 = vector.broadcast %36 : f32 to vector<1x8x128xf32>
    %52 = arith.select %45, %51, %50 : vector<1x8x128xi1>, vector<1x8x128xf32>
    %c0_13 = arith.constant 0 : index
    %c0_14 = arith.constant 0 : index
    %c0_15 = arith.constant 0 : index
    %53 = vector.load %arg3[%c0_13, %c0_14, %c0_15] : memref<1x8x128xf32, #tpu.memory_space<vmem>>, vector<1x8x128xf32>
    tpu.vector_store %arg3[%c0_13, %c0_14, %c0_15], %52 {strides = array<i32>} : memref<1x8x128xf32, #tpu.memory_space<vmem>>, vector<1x8x128xf32>,
    return
  }
  func.func @transform_0(%arg0: i32) -> (i32, i32) {
    %c0_i32 = arith.constant 0 : i32
    %c0_i32_0 = arith.constant 0 : i32
    return %arg0, %c0_i32 : i32, i32
  }
  func.func @transform_1(%arg0: i32) -> (i32, i32) {
    %c0_i32 = arith.constant 0 : i32
    %c0_i32_0 = arith.constant 0 : i32
    return %arg0, %c0_i32 : i32, i32
  }
  func.func @transform_2(%arg0: i32) -> (i32, i32, i32) {
    %c0_i32 = arith.constant 0 : i32
    %c0_i32_0 = arith.constant 0 : i32
    %c0_i32_1 = arith.constant 0 : i32
    return %arg0, %c0_i32, %c0_i32_0 : i32, i32, i32
  }
}

</mosaic_0001>

<bundles_post_ra>
// kernel: tpu_custom_call.1
= control target key start
LH: loop header
LB: loop body
LE: loop exit
PB: predicated region body
PF: predicated region fallthrough
CT: control target
= control target key end

     0   :  { %7 = vsyncpa [#allocation3], 0  ;;  %s540_s0 = inlined_call_operand.vmem [shape: f32[24,128], index: 0, kind: input, shape index: {}]   ;;  %s541_s1 = inlined_call_operand.vmem [shape: s32[24,1], index: 1, kind: input, shape index: {}]   ;;  %s542_s2 = inlined_call_operand.hbm [shape: f32[3,8,128], index: 2, kind: output, shape index: {}]  }
   0x1   :  { %9 = vsyncpa [#allocation3 + $0x1], 0  ;;  %s443_s9 = smov 0   ;;  %s445_s10 = smov 0  }
   0x2   :  { %s447_s11 = smov 0   ;;  %s449_s12 = smov 0  }
   0x3 LB: > { %s464_s13 = sadd.s32 4294967295, %s424_s12   ;;  %s303_s14 = sadd.s32 4294967294, %s424_s12   ;;  %s424_s12 = sphi %s449_s12, %s548_s12   ;;  %s420_s11 = sphi %s447_s11, %s547_s11   ;;  %s416_s10 = sphi %s445_s10, %s546_s10   ;;  %s412_s9 = sphi %s443_s9, %s545_s9  }
   0x4   : > { %s468_s15 = sadd.s32 1, %s424_s12   ;;  %s74_s16 = sadd.s32 1, %s420_s11 }
   0x5   : > { %s71_s17 = ssub.s32 %s424_s12, %s468_s15  ;;  %p84_p0 = scmp.ne.s32.totalorder %s420_s11, %s416_s10 }
   0x6   : > { %p72_p1 = scmp.eq.s32.totalorder %s71_s17, 0  ;;  %p85_p2 = scmp.eq.s32.totalorder %s464_s13, 2 }
   0x7   : > { %p90_p3 = scmp.ne.s32.totalorder %s416_s10, %s412_s9  ;;  %p91_p4 = scmp.eq.s32.totalorder %s303_s14, 2 }
   0x8   : > { %s479_s18 = scalar_select %p72_p1, %s420_s11, %s74_s16  }
   0x9   : > { %p481_p5 = por %p85_p2, %p84_p0  ;;  %p485_p6 = por %p91_p4, %p90_p3 }
   0xa   : > { %p306_p7 = scmp.ge.s32.totalorder %s424_s12, 1  ;;  %p123_p8 = scmp.lt.s32.totalorder %s424_s12, 4 }
   0xc   : > { %p124_p9 = pnand %p306_p7, %p123_p8 }
   0xd   : > { %p148_p10 = scmp.lt.s32.totalorder (!%p124_p9), %s464_s13, 2  ;;  %s310_s29 = sshll.u32 (!%p124_p9), %s464_s13, 3 }
   0xe   : > { %127 = sbr.rel (%p124_p9) target bundleno = 562 (0x232), region = 28  ;;  %s145_s30 = sand.u32 (!%p124_p9), 1, %s416_s10  }
   0xf   : > { %s307_s3 = sshll.u32 (!%p124_p9), %s145_s30, 3  ;;  %s312_s4 = sshll.u32 (!%p124_p9), %s464_s13, 7 }
  0x10   : > { %s147_s6 = scalar_lea.vmem (!%p124_p9), [#allocation2], %s307_s3  ;;  %s505_s17 = scalar_lea.hbm (!%p124_p9), %s542_s2, %s312_s4 }
  0x11   : > { %s232_s7 = sshll.u32 (!%p124_p9), %s147_s6, 4  ;;  %s233_s7 = int_to_ptr.vmem [resolvable:$true] %s232_s7 }
  0x13   : > { %v426_v0 = vmov 0   ;;  %s149_s21 = scalar_select %p148_p10, %s464_s13, 2  ;;  %v171_v6 = vlaneseq  ;;  %v185_v16 = vstv %s310_s29  ;;  %vm189_vm2 = vcmask 7168  }
  0x14   : > { %359 = vset.pattern.permute.xlu0 %v426_v0  ;;  %s364_s13 = scalar_lea.vmem %s233_s7, 128 }
  0x15   : > { %s308_s22 = sshll.u32 %s149_s21, 3  ;;  %v172_v7 = vand.u32 127, %v171_v6  ;;  %v184_v14 = vshrl.u32 %v171_v6, 7  ;;  %s219_s21 = scalar_lea.sflag [#allocation3], %s145_s30 }
  0x16   : > { %s151_s25 = scalar_lea.vmem %s540_s0, %s308_s22  ;;  %s155_s28 = scalar_lea.vmem %s541_s1, %s308_s22 }
  0x17   : > { %v156_v1 = vld [vmem:[%s151_s25] sm:$0xff]  ;;  %v186_v19 = vadd.s32 %v185_v16, %v184_v14  ;;  %vm212_vm3 = vcmp.eq.s32.totalorder %v184_v14, 1  ;;  %vm211_vm4 = vcmp.eq.s32.totalorder %v184_v14, 0  ;;  %p365_p11 = scmp.ne.s32.totalorder %s233_s7, %s364_s13  ;;  %s427_s22 = smov [#allocation2]  }
  0x18   : > { %157 = vmax.xlane.f32.xlu0 %v156_v1  ;;  %v173_v2 = vld [vmem:[%s155_s28] sm:$0xff]  ;;  %s368_s23 = sshll.u32 %s427_s22, 4  ;;  %s369_s23 = int_to_ptr.vmem [resolvable:$false] %s368_s23 }
  0x19   : > { %vm187_vm1 = vcmp.lt.s32.totalorder %v186_v19, 24  ;;  %p366_p12 = pnand %p365_p11, %p481_p5  ;;  %s370_s24 = scalar_lea.vmem %s369_s23, 256 }
  0x1a   : > { %p371_p0 = scmp.lt.s32.totalorder %s233_s7, %s369_s23  ;;  %p372_p1 = scmp.lt.s32.totalorder %s370_s24, %s364_s13 }
  0x1b   : > { %p367_p13 = pneg %p366_p12 }
  0x1c   : > { %p373_p2 = por %p372_p1, %p371_p0 }
  0x1e   : > { %p374_p3 = pnand %p373_p2, %p367_p13 }
  0x2e   : > { %175 = vperm.xlu0 %359, %v173_v2  }
  0xa1   : > { %v158_v3 = vpop.xlane.xlu0 %157 }
  0xa2   : > { %v159_v4 = vsub.f32 %v156_v1, %v158_v3 }
  0xa4   : > { %v160_v5 = vmul.f32 1.442695, %v159_v4 }
  0xa6   : > { %360 = vpow2.f32 %v160_v5 }
  0xa9   : > { %v176_v9 = vpop.permute.xlu0 %175 }
  0xaa   : > { %vm177_vm0 = vcmp.eq.s32.totalorder %v172_v7, %v176_v9 }
  0xab   : > { %v178_v10 = vsel %vm177_vm0, %v156_v1, 0.0 }
  0xb3   : > { %v361_v8 = vpop.eup %360 }
  0xb4   : > { %162 = vadd.xlane.f32.xlu1 %v361_v8 }
  0xb8   : > { %167 = vadd.xlane.f32.xlu1 %v156_v1 }
  0xbc   : > { %179 = vadd.xlane.f32.xlu1 %v178_v10 }
 0x13d   : > { %v163_v11 = vpop.xlane.xlu1 %162 }
 0x13e   : > { %362 = vlog2.f32 %v163_v11 }
 0x141   : > { %v168_v12 = vpop.xlane.xlu1 %167 }
 0x145   : > { %v180_v18 = vpop.xlane.xlu1 %179 }
 0x14b   : > { %v363_v13 = vpop.eup %362 }
 0x14c   : > { %v165_v15 = vmul.f32 0.6931472, %v363_v13 }
 0x14e   : > { %v166_v17 = vadd.f32 %v165_v15, %v158_v3 }
 0x150   : > { %v169_v20 = vmul.f32 128.0, %v166_v17  ;;  %v181_v22 = vsub.f32 %v166_v17, %v180_v18 }
 0x152   : > { %v170_v21 = vsub.f32 %v169_v20, %v168_v12  ;;  %v200_v25 = vsel %vm187_vm1, %v181_v22, 0.0 }
 0x153   : > { %v201_v26 = vsel %vm189_vm2, %v200_v25, 0.0 }
 0x154   : > { %v188_v23 = vsel %vm187_vm1, %v170_v21, 0.0 }
 0x155   : > { %v190_v24 = vsel %vm189_vm2, %v188_v23, 0.0 }
 0x156   : > { %191 = vadd.xlane.f32.xlu1 %v190_v24 }
 0x15a   : > { %202 = vadd.xlane.f32.xlu1 %v201_v26 }
 0x1df   : > { %v192_v27 = vpop.xlane.xlu1 %191 }
 0x1e0   : > { %v193_v28 = vrot.slane %v192_v27, 4 }
 0x1e2   : > { %v194_v29 = vadd.f32 %v193_v28, %v192_v27 }
 0x1e3   : > { %v203_v30 = vpop.xlane.xlu1 %202 }
 0x1e4   : > { %v195_v31 = vrot.slane %v194_v29, 2  ;;  %v204_v32 = vrot.slane %v203_v30, 4 }
 0x1e6   : > { %v205_v33 = vadd.f32 %v204_v32, %v203_v30  ;;  %v196_v34 = vadd.f32 %v195_v31, %v194_v29 }
 0x1e8   : > { %v206_v35 = vrot.slane %v205_v33, 2  ;;  %v197_v36 = vrot.slane %v196_v34, 1 }
 0x1ea   : > { %v207_v37 = vadd.f32 %v206_v35, %v205_v33  ;;  %v198_v38 = vadd.f32 %v197_v36, %v196_v34 }
 0x1ec   : > { %315 = vpush %v198_v38  ;;  %v208_v39 = vrot.slane %v207_v37, 1 }
 0x1ee   : > { %v209_v40 = vadd.f32 %v208_v39, %v207_v37 }
 0x1f0   : > { %317 = vpush %v209_v40 }
 0x21d   : > { %s316_s5 = spop %315 }
 0x21e   : > { %v215_v42 = vstv %s316_s5 }
 0x221   : > { %s318_s8 = spop %317 }
 0x222   : > { %v213_v41 = vstv %s318_s8 }
 0x223   : > { %v214_v43 = vsel %vm212_vm3, %v213_v41, 0.0 }
 0x224   : > { %v216_v44 = vsel %vm211_vm4, %v215_v42, %v214_v43 }
 0x225   : > { %217 = vst [vmem:[%s147_s6] sm:$0xff] %v216_v44 }
 0x226   : > { %377 = shalt.err (!%p374_p3)
}
 0x227   : > { %s378_s25 = scalar_lea.hbm %s505_s17, 128  ;;  %s382_s28 = scalar_lea.hbm %s542_s2, 384 }
 0x228   : > { %p379_p4 = scmp.ne.s32.totalorder %s505_s17, %s378_s25  ;;  %p383_p9 = scmp.lt.s32.totalorder %s505_s17, %s542_s2 }
 0x229   : > { %p384_p10 = scmp.lt.s32.totalorder %s382_s28, %s378_s25 }
 0x22a   : > { %p380_p7 = pnand %p379_p4, %p481_p5 }
 0x22b   : > { %p385_p11 = por %p384_p10, %p383_p9 }
 0x22c   : > { %p381_p8 = pneg %p380_p7 }
 0x22e   : > { %p386_p12 = pnand %p385_p11, %p381_p8 }
 0x230   : > { %389 = shalt.err (!%p386_p12)
}
 0x231   : > { %319 = dma.vmem_to_hbm [thread:$0]  (%p481_p5), %s233_s7, 128, %s505_s17, %s219_s21  }
 0x232 PF: > { %p325_p13 = scmp.ge.s32.totalorder %s424_s12, 2  ;;  %s244_s3 = sand.u32 1, %s412_s9  }
 0x233   : > { %s245_s4 = scalar_lea.sflag [#allocation3], %s244_s3 }
 0x234   : > { %p322_p0 = pnand %p325_p13, %p485_p6 }
 0x236   : > { %p323_p1 = pneg %p322_p0 }
 0x238   : > { %407 = dma.done.wait (%p323_p1), %s245_s4, 128  }
 0x239   : > { %409 = vsyncadd (%p323_p1), %s245_s4, 4294967168  ;;  %p12_p2 = scmp.ge.s32.totalorder %s468_s15, 5   ;;  %s545_s9 = smov %s416_s10 }
 0x23a   : > { %s546_s10 = smov %s420_s11  ;;  %s547_s11 = smov %s479_s18 }
 0x23b   : > { %s548_s12 = smov %s468_s15  ;;  %14 = sbr.rel (!%p12_p2) target bundleno = 3 (0x3), region = 66 }
 0x240   :  { %250 = vsyncpa [#allocation3], 1 }
 0x241   :  { %252 = vsyncpa [#allocation3 + $0x1], 1 }

</bundles_post_ra>
